<compile_context>
chip_gen: v7x
topology: tpu7x:2x2x1
jax: 0.10.0
libtpu: 0.0.40
codegen_flags: <defaults>
</compile_context>

<pallas_src>
import functools

import jax
import jax.numpy as jnp
from jax import lax
from jax.experimental import pallas as pl
from jax.experimental.pallas import tpu as pltpu

EPS = 1e-5


# ----------------------------------------------------------------------------
# Kernels
# ----------------------------------------------------------------------------
def _adaibn_kernel_pure(n_in_blocks, x_ref, gamma_ref, beta_ref, out_ref,
                        scale_ref, shift_ref):
    """Block is either all-IN or all-BN channels (boundary aligned to c_tile).

    gamma/beta (1, c_tile, 1), f32:
      * IN blocks (channel-tile index < n_in_blocks): gamma = AdaIN weight,
        beta = AdaIN bias; mean/inv-std come from the in-block HW reduction.
      * BN blocks: gamma/beta already hold the fully folded batch-norm
        scale/shift, used directly — no reduction work at all.
    """
    g = gamma_ref[...]
    be = beta_ref[...]
    scale_ref[...] = g
    shift_ref[...] = be

    @pl.when(pl.program_id(1) < n_in_blocks)
    def _():
        # Single-pass IN statistics: E[x] and E[x^2], f32 accumulation.
        xf = x_ref[...].astype(jnp.float32)
        mu = jnp.mean(xf, axis=-1, keepdims=True)
        ex2 = jnp.mean(xf * xf, axis=-1, keepdims=True)
        var = jnp.maximum(ex2 - mu * mu, 0.0)
        inv = lax.rsqrt(var + EPS)
        s = inv * g
        scale_ref[...] = s
        shift_ref[...] = be - mu * s

    # Two VPU ops per element on the bulk data; apply in the input dtype.
    x = x_ref[...]
    out_ref[...] = (x * scale_ref[...].astype(x.dtype)
                    + shift_ref[...].astype(x.dtype)).astype(out_ref.dtype)


def _adaibn_kernel_mixed(x_ref, gamma_ref, beta_ref, isin_ref, out_ref):
    """Fallback for blocks that straddle the IN/BN channel boundary."""
    x = x_ref[...]
    xf = x.astype(jnp.float32)
    mu = jnp.mean(xf, axis=-1, keepdims=True)
    ex2 = jnp.mean(xf * xf, axis=-1, keepdims=True)
    var = jnp.maximum(ex2 - mu * mu, 0.0)
    inv = lax.rsqrt(var + EPS)

    g = gamma_ref[...]
    be = beta_ref[...]
    m = isin_ref[...] > 0.5                 # True -> IN channel

    s_in = inv * g
    scale = jnp.where(m, s_in, g)
    shift = jnp.where(m, be - mu * s_in, be)
    out_ref[...] = (x * scale.astype(x.dtype)
                    + shift.astype(x.dtype)).astype(out_ref.dtype)


# ----------------------------------------------------------------------------
# Tiling heuristics
# ----------------------------------------------------------------------------
def _gen_params():
    """(target block bytes, scoped VMEM limit) per TPU generation."""
    kind = ""
    try:
        kind = jax.devices()[0].device_kind.lower()
    except Exception:
        pass
    if "7" in kind:                     # v7x: 64 MiB VMEM per TensorCore
        return 3 * 1024 * 1024, 40 * 1024 * 1024
    if "v5" in kind or "v6" in kind:    # 128 MiB physical VMEM
        return 6 * 1024 * 1024, 64 * 1024 * 1024
    return 3 * 1024 * 1024, 32 * 1024 * 1024   # unknown: conservative


def _pick_c_tile(C, half, HW, itemsize, target_bytes, B):
    """Channel tile size.

    Legal tiles: divisors of C that are a multiple of the dtype's sublane
    packing (8 f32 / 16 bf16 / 32 int8), plus full C.  Preference
    (lexicographic): block does not straddle the IN/BN boundary (pure ->
    cheaper kernel), grid has >= 4 blocks (feeds both v7x TensorCores),
    then largest tile.
    """
    align = max(32 // max(itemsize, 1), 8)
    row_bytes = HW * itemsize
    cands = [t for t in range(align, C, align) if C % t == 0]
    cands.append(C)                     # full-C block is always layout-legal
    fitting = [t for t in cands if t * row_bytes <= target_bytes]
    if not fitting:
        # Never silently fall back to full C when it blows the VMEM budget.
        return min(cands)

    def score(t):
        pure = (half % t == 0)
        enough = (B * (C // t) >= 4)
        return (pure, enough, t)

    return max(fitting, key=score)


# ----------------------------------------------------------------------------
# Forward wrapper
# ----------------------------------------------------------------------------
def adaibn_forward(x, ada_weight, ada_bias, bn_weight, bn_bias, half, *,
                   c_tile=None):
    """AdaIBN (cfg='a') forward.  x: (B, C, H, W) NCHW.

    ada_weight/ada_bias: (B*half,) externally assigned AdaIN affine params.
    bn_weight/bn_bias:   (C-half,) BatchNorm2d affine params.
    """
    B, C, H, W = x.shape
    C1 = int(half)
    C2 = C - C1
    HW = H * W

    x_r = x.reshape(B, C, HW)           # free reshape (NCHW contiguous)

    # ---- BN-half batch statistics: ONE fused pass (sum & sum-of-squares,
    # f32 accumulation; XLA fuses the upcast/square into the reduce) ----
    x_bn = x_r[:, C1:, :]
    n_bn = B * HW
    s1 = jnp.sum(x_bn, axis=(0, 2), dtype=jnp.float32)
    s2 = jnp.sum(jnp.square(x_bn.astype(jnp.float32)), axis=(0, 2),
                 dtype=jnp.float32)
    mu2 = s1 / n_bn
    var2 = jnp.maximum(s2 / n_bn - jnp.square(mu2), 0.0)
    inv2 = lax.rsqrt(var2 + EPS)
    scale_bn = inv2 * bn_weight.astype(jnp.float32)        # folded BN scale
    shift_bn = bn_bias.astype(jnp.float32) - mu2 * scale_bn  # folded BN shift

    # ---- Per-(b, c) parameter planes covering the full channel axis ----
    gamma = jnp.concatenate(
        [ada_weight.reshape(B, C1).astype(jnp.float32),
         jnp.broadcast_to(scale_bn[None, :], (B, C2))], axis=1).reshape(B, C, 1)
    beta = jnp.concatenate(
        [ada_bias.reshape(B, C1).astype(jnp.float32),
         jnp.broadcast_to(shift_bn[None, :], (B, C2))], axis=1).reshape(B, C, 1)

    target_bytes, vmem_limit = _gen_params()
    if c_tile is None:
        c_tile = _pick_c_tile(C, C1, HW, jnp.dtype(x.dtype).itemsize,
                              target_bytes, B)
    assert C % c_tile == 0

    grid = (B, C // c_tile)
    x_spec = pl.BlockSpec((1, c_tile, HW), lambda b, j: (b, j, 0))
    p_spec = pl.BlockSpec((1, c_tile, 1), lambda b, j: (b, j, 0))
    cparams = pltpu.CompilerParams(
        dimension_semantics=("parallel", "parallel"),
        vmem_limit_bytes=vmem_limit)

    if C1 % c_tile == 0:
        # Pure IN or pure BN blocks: BN blocks skip the HW reduction entirely.
        kernel = functools.partial(_adaibn_kernel_pure, C1 // c_tile)
        out = pl.pallas_call(
            kernel,
            out_shape=jax.ShapeDtypeStruct((B, C, HW), x.dtype),
            grid_spec=pltpu.PrefetchScalarGridSpec(
                num_scalar_prefetch=0,
                grid=grid,
                in_specs=[x_spec, p_spec, p_spec],
                out_specs=x_spec,
                scratch_shapes=[pltpu.VMEM((1, c_tile, 1), jnp.float32),
                                pltpu.VMEM((1, c_tile, 1), jnp.float32)]),
            compiler_params=cparams,
        )(x_r, gamma, beta)
    else:
        # A tile straddles the IN/BN boundary: per-channel mask fallback.
        is_in = jnp.broadcast_to(
            jnp.concatenate([jnp.ones((C1,), jnp.float32),
                             jnp.zeros((C2,), jnp.float32)])[None, :, None],
            (B, C, 1)).astype(jnp.float32)
        out = pl.pallas_call(
            _adaibn_kernel_mixed,
            out_shape=jax.ShapeDtypeStruct((B, C, HW), x.dtype),
            grid_spec=pltpu.PrefetchScalarGridSpec(
                num_scalar_prefetch=0,
                grid=grid,
                in_specs=[x_spec, p_spec, p_spec, p_spec],
                out_specs=x_spec),
            compiler_params=cparams,
        )(x_r, gamma, beta, is_in)

    return out.reshape(B, C, H, W)


# ----------------------------------------------------------------------------
# Pure-JAX reference (mirrors the PyTorch forward)
# ----------------------------------------------------------------------------
def adaibn_reference(x, ada_weight, ada_bias, bn_weight, bn_bias, half):
    B, C, H, W = x.shape
    C1 = half
    x1 = x[:, :C1].astype(jnp.float32)
    x2 = x[:, C1:].astype(jnp.float32)
    # AdaIN (F.batch_norm on (1, B*C1, H, W), training=True == per-(b,c) IN)
    mu1 = jnp.mean(x1, axis=(2, 3), keepdims=True)
    var1 = jnp.mean((x1 - mu1) ** 2, axis=(2, 3), keepdims=True)
    wa = ada_weight.reshape(B, C1, 1, 1)
    ba = ada_bias.reshape(B, C1, 1, 1)
    out1 = (x1 - mu1) / jnp.sqrt(var1 + EPS) * wa + ba
    # BatchNorm2d in training mode
    mu2 = jnp.mean(x2, axis=(0, 2, 3), keepdims=True)
    var2 = jnp.mean((x2 - mu2) ** 2, axis=(0, 2, 3), keepdims=True)
    wb = bn_weight.reshape(1, -1, 1, 1)
    bb = bn_bias.reshape(1, -1, 1, 1)
    out2 = (x2 - mu2) / jnp.sqrt(var2 + EPS) * wb + bb
    return jnp.concatenate([out1, out2], axis=1).astype(x.dtype)


if __name__ == "__main__":
    key = jax.random.PRNGKey(0)

    def run_case(B, planes, H, W, ratio, case_key):
        half = int(planes * ratio)
        kx, kw, kb = jax.random.split(case_key, 3)
        x = jax.random.normal(kx, (B, planes, H, W), dtype=jnp.float32)
        # AdaIN weight/bias are assigned externally in PyTorch; shape (B*half,)
        ada_weight = 1.0 + 0.1 * jax.random.normal(kw, (B * half,), jnp.float32)
        ada_bias = 0.1 * jax.random.normal(kb, (B * half,), jnp.float32)
        # BatchNorm2d default init
        bn_weight = jnp.ones((planes - half,), jnp.float32)
        bn_bias = jnp.zeros((planes - half,), jnp.float32)

        out = adaibn_forward(x, ada_weight, ada_bias, bn_weight, bn_bias, half)
        out = jax.block_until_ready(out)
        ref = adaibn_reference(x, ada_weight, ada_bias, bn_weight, bn_bias, half)
        assert out.shape == x.shape
        assert jnp.allclose(out, ref, atol=1e-4, rtol=1e-4), \
            f"mismatch vs reference for shape {(B, planes, H, W)}"

    k1, k2 = jax.random.split(key)
    # Tiny channel count: tile straddles the IN/BN boundary -> masked kernel.
    run_case(2, 4, 16, 16, 0.5, k1)
    # Larger channel count: boundary-aligned tiles -> pure (pl.when) kernel,
    # BN blocks skip the statistics reduction entirely.
    run_case(2, 32, 16, 16, 0.5, k2)

    print("KERNEL_OK")
</pallas_src>

<mosaic_0001>
module attributes {stable_mosaic.version = 11 : i64} {
  func.func @_adaibn_kernel_mixed(%arg0: i32, %arg1: i32, %arg2: memref<1x4x256xf32, #tpu.memory_space<vmem>>, %arg3: memref<1x4x1xf32, #tpu.memory_space<vmem>>, %arg4: memref<1x4x1xf32, #tpu.memory_space<vmem>>, %arg5: memref<1x4x1xf32, #tpu.memory_space<vmem>>, %arg6: memref<1x4x256xf32, #tpu.memory_space<vmem>>) attributes {dimension_semantics = [#tpu.dimension_semantics<parallel>, #tpu.dimension_semantics<parallel>], iteration_bounds = array<i64: 2, 1>, scalar_prefetch = 0 : i64, scratch_operands = 0 : i64, tpu.core_type = #tpu.core_type<tc>, window_params = [{transform_indices = @transform_0, window_bounds = array<i64: 1, 4, 256>}, {transform_indices = @transform_1, window_bounds = array<i64: 1, 4, 1>}, {transform_indices = @transform_2, window_bounds = array<i64: 1, 4, 1>}, {transform_indices = @transform_3, window_bounds = array<i64: 1, 4, 1>}, {transform_indices = @transform_4, window_bounds = array<i64: 1, 4, 256>}]} {
    %c0 = arith.constant 0 : index
    %c0_0 = arith.constant 0 : index
    %c0_1 = arith.constant 0 : index
    %0 = vector.load %arg2[%c0, %c0_0, %c0_1] : memref<1x4x256xf32, #tpu.memory_space<vmem>>, vector<1x4x256xf32>
    %cst = arith.constant dense<0.000000e+00> : vector<1x4xf32>
    %1 = vector.multi_reduction <add>, %0, %cst [2] : vector<1x4x256xf32> to vector<1x4xf32>
    %2 = vector.shape_cast %1 : vector<1x4xf32> to vector<1x4x1xf32>
    %cst_2 = arith.constant 2.560000e+02 : f32
    %3 = vector.broadcast %cst_2 : f32 to vector<1x4x1xf32>
    %4 = arith.divf %2, %3 : vector<1x4x1xf32>
    %5 = arith.mulf %0, %0 : vector<1x4x256xf32>
    %cst_3 = arith.constant dense<0.000000e+00> : vector<1x4xf32>
    %6 = vector.multi_reduction <add>, %5, %cst_3 [2] : vector<1x4x256xf32> to vector<1x4xf32>
    %7 = vector.shape_cast %6 : vector<1x4xf32> to vector<1x4x1xf32>
    %cst_4 = arith.constant 2.560000e+02 : f32
    %8 = vector.broadcast %cst_4 : f32 to vector<1x4x1xf32>
    %9 = arith.divf %7, %8 : vector<1x4x1xf32>
    %10 = arith.mulf %4, %4 : vector<1x4x1xf32>
    %11 = arith.subf %9, %10 : vector<1x4x1xf32>
    %cst_5 = arith.constant 0.000000e+00 : f32
    %12 = vector.broadcast %cst_5 : f32 to vector<1x4x1xf32>
    %13 = arith.maximumf %11, %12 : vector<1x4x1xf32>
    %cst_6 = arith.constant 9.99999974E-6 : f32
    %14 = vector.broadcast %cst_6 : f32 to vector<1x4x1xf32>
    %15 = arith.addf %13, %14 : vector<1x4x1xf32>
    %16 = math.rsqrt %15 : vector<1x4x1xf32>
    %c0_7 = arith.constant 0 : index
    %c0_8 = arith.constant 0 : index
    %c0_9 = arith.constant 0 : index
    %17 = vector.load %arg3[%c0_7, %c0_8, %c0_9] : memref<1x4x1xf32, #tpu.memory_space<vmem>>, vector<1x4x1xf32>
    %c0_10 = arith.constant 0 : index
    %c0_11 = arith.constant 0 : index
    %c0_12 = arith.constant 0 : index
    %18 = vector.load %arg4[%c0_10, %c0_11, %c0_12] : memref<1x4x1xf32, #tpu.memory_space<vmem>>, vector<1x4x1xf32>
    %c0_13 = arith.constant 0 : index
    %c0_14 = arith.constant 0 : index
    %c0_15 = arith.constant 0 : index
    %19 = vector.load %arg5[%c0_13, %c0_14, %c0_15] : memref<1x4x1xf32, #tpu.memory_space<vmem>>, vector<1x4x1xf32>
    %cst_16 = arith.constant 5.000000e-01 : f32
    %20 = vector.broadcast %cst_16 : f32 to vector<1x4x1xf32>
    %21 = arith.cmpf ogt, %19, %20 : vector<1x4x1xf32>
    %22 = arith.mulf %16, %17 : vector<1x4x1xf32>
    %23 = arith.select %21, %22, %17 : vector<1x4x1xi1>, vector<1x4x1xf32>
    %24 = arith.mulf %4, %22 : vector<1x4x1xf32>
    %25 = arith.subf %18, %24 : vector<1x4x1xf32>
    %26 = arith.select %21, %25, %18 : vector<1x4x1xi1>, vector<1x4x1xf32>
    %27 = vector.broadcast %23 : vector<1x4x1xf32> to vector<1x4x256xf32>
    %28 = arith.mulf %0, %27 : vector<1x4x256xf32>
    %29 = vector.broadcast %26 : vector<1x4x1xf32> to vector<1x4x256xf32>
    %30 = arith.addf %28, %29 : vector<1x4x256xf32>
    %c0_17 = arith.constant 0 : index
    %c0_18 = arith.constant 0 : index
    %c0_19 = arith.constant 0 : index
    %31 = vector.load %arg6[%c0_17, %c0_18, %c0_19] : memref<1x4x256xf32, #tpu.memory_space<vmem>>, vector<1x4x256xf32>
    tpu.vector_store %arg6[%c0_17, %c0_18, %c0_19], %30 {strides = array<i32>} : memref<1x4x256xf32, #tpu.memory_space<vmem>>, vector<1x4x256xf32>,
    return
  }
  func.func @transform_0(%arg0: i32, %arg1: i32) -> (i32, i32, i32) {
    %c0_i32 = arith.constant 0 : i32
    %c0_i32_0 = arith.constant 0 : i32
    return %arg0, %arg1, %c0_i32 : i32, i32, i32
  }
  func.func @transform_1(%arg0: i32, %arg1: i32) -> (i32, i32, i32) {
    %c0_i32 = arith.constant 0 : i32
    %c0_i32_0 = arith.constant 0 : i32
    return %arg0, %arg1, %c0_i32 : i32, i32, i32
  }
  func.func @transform_2(%arg0: i32, %arg1: i32) -> (i32, i32, i32) {
    %c0_i32 = arith.constant 0 : i32
    %c0_i32_0 = arith.constant 0 : i32
    return %arg0, %arg1, %c0_i32 : i32, i32, i32
  }
  func.func @transform_3(%arg0: i32, %arg1: i32) -> (i32, i32, i32) {
    %c0_i32 = arith.constant 0 : i32
    %c0_i32_0 = arith.constant 0 : i32
    return %arg0, %arg1, %c0_i32 : i32, i32, i32
  }
  func.func @transform_4(%arg0: i32, %arg1: i32) -> (i32, i32, i32) {
    %c0_i32 = arith.constant 0 : i32
    %c0_i32_0 = arith.constant 0 : i32
    return %arg0, %arg1, %c0_i32 : i32, i32, i32
  }
}

</mosaic_0001>

<bundles_post_ra>
// kernel: tpu_custom_call.1
= control target key start
LH: loop header
LB: loop body
LE: loop exit
PB: predicated region body
PF: predicated region fallthrough
CT: control target
= control target key end

     0   :  { %9 = vsyncpa [#allocation3], 0  ;;  %s821_s0 = inlined_call_operand.vmem [shape: f32[2,4,256], index: 0, kind: input, shape index: {}]   ;;  %s822_s1 = inlined_call_operand.vmem [shape: f32[2,4,1], index: 1, kind: input, shape index: {}]   ;;  %s823_s2 = inlined_call_operand.vmem [shape: f32[2,4,1], index: 2, kind: input, shape index: {}]   ;;  %s824_s3 = inlined_call_operand.vmem [shape: f32[2,4,1], index: 3, kind: input, shape index: {}]   ;;  %s825_s4 = inlined_call_operand.hbm [shape: f32[2,4,256], index: 4, kind: output, shape index: {}]  }
   0x1   :  { %11 = vsyncpa [#allocation3 + $0x1], 0  ;;  %s700_s15 = smov 0   ;;  %s702_s16 = smov 0  }
   0x2   :  { %s704_s17 = smov 0   ;;  %s706_s18 = smov 0  }
   0x3   :  { %s708_s19 = smov 0   ;;  %s710_s20 = smov 0  }
   0x4 LB: > { %s512_s21 = sadd.s32 4294967295, %s670_s20   ;;  %s513_s22 = sadd.s32 4294967294, %s670_s20   ;;  %s670_s20 = sphi %s710_s20, %s17_s20   ;;  %s666_s19 = sphi %s708_s19, %s832_s19   ;;  %s662_s18 = sphi %s706_s18, %s831_s18   ;;  %s658_s17 = sphi %s704_s17, %s830_s17   ;;  %s654_s16 = sphi %s702_s16, %s829_s16   ;;  %s650_s15 = sphi %s700_s15, %s828_s15  }
   0x5   : > { %s29_s23 = sadd.s32 1, %s666_s19  ;;  %s150_s24 = sadd.s32 1, %s658_s17 }
   0x6   : > { %p31_p0 = scmp.ge.s32.totalorder %s29_s23, 2  ;;  %p160_p1 = scmp.ne.s32.totalorder %s658_s17, %s654_s16 }
   0x7   : > { %p161_p2 = scmp.eq.s32.totalorder %s512_s21, 1  ;;  %p166_p3 = scmp.ne.s32.totalorder %s654_s16, %s650_s15 }
   0x8   : > { %s834_s23 = smov (%p31_p0, %s29_s23), 0  ;;  %p167_p5 = scmp.eq.s32.totalorder %s513_s22, 1 }
   0x9   : > { %p740_p4 = por %p161_p2, %p160_p1  ;;  %s145_s26 = ssub.s32 %s666_s19, %s834_s23 }
   0xa   : > { %p516_p6 = scmp.ge.s32.totalorder %s670_s20, 1  ;;  %p148_p7 = scmp.eq.s32.totalorder %s145_s26, 0 }
   0xb   : > { %p747_p8 = por %p167_p5, %p166_p3  ;;  %p227_p9 = scmp.lt.s32.totalorder %s670_s20, 3 }
   0xc   : > { %s753_s28 = scalar_select %p148_p7, %s658_s17, %s150_s24  }
   0xd   : > { %p228_p10 = pnand %p516_p6, %p227_p9 }
   0xe   : > { %p278_p11 = scmp.lt.s32.totalorder (!%p228_p10), %s662_s18, 1  ;;  %vm312_vm0 = vcmask (!%p228_p10), 1043456   ;;  %v672_v10 = vmov (!%p228_p10), 0   ;;  %v673_v28 = vmov (!%p228_p10), 839922192   ;;  %v351_v30 = vlaneseq (!%p228_p10)  ;;  %s275_s26 = sand.u32 (!%p228_p10), 1, %s654_s16  }
   0xf   : > { %231 = sbr.rel (%p228_p10) target bundleno = 350 (0x15e), region = 36  ;;  %587 = vset.pattern.permute.xlu1 (!%p228_p10), %v672_v10  ;;  %588 = vset.pattern.permute.xlu0 (!%p228_p10), %v672_v10  ;;  %v349_v29 = vunpack.c.l.s4 (!%p228_p10), %v673_v28  ;;  %s372_s10 = scalar_lea.sflag (!%p228_p10), [#allocation3], %s275_s26 }
  0x10   : > { %v352_v32 = vshrl.u32 (!%p228_p10), %v351_v30, 7 }
  0x11   : > { %v350_v31 = vunpack.c.0.s8 (!%p228_p10), %v349_v29 }
  0x13   : > { %v353_v33 = vsub.s32 (!%p228_p10), %v350_v31, %v352_v32 }
  0x16   : > { %s279_s29 = scalar_select %p278_p11, %s662_s18, 1 }
  0x18   : > { %s528_s30 = sshll.u32 %s279_s29, 3  ;;  %s520_s8 = sshll.u32 %s279_s29, 2 }
  0x19   : > { %s286_s7 = scalar_lea.vmem %s821_s0, %s528_s30  ;;  %s307_s11 = scalar_lea.vmem %s824_s3, %s520_s8 }
  0x1a   : > { %v308_v0 = vld [vmem:[%s286_s7] sm:$0xff]  ;;  %s293_s14 = scalar_lea.vmem %s822_s1, %s520_s8  ;;  %s300_s24 = scalar_lea.vmem %s823_s2, %s520_s8 }
  0x1b   : > { %v310_v1 = vcombine.high %v308_v0, %v308_v0  ;;  %v313_v2 = vsel %vm312_vm0, %v308_v0, 0.0  ;;  %v320_v3 = vmul.f32 %v308_v0, %v308_v0  ;;  %v337_v19 = vld [vmem:[%s307_s11] sm:$0xf]  ;;  %s517_s29 = sshll.u32 %s275_s26, 3  ;;  %s529_s30 = sshll.u32 %s662_s18, 7 }
  0x1c   : > { %v335_v20 = vld [vmem:[%s293_s14] sm:$0xf]  ;;  %vm338_vm1 = vcmp.gt.f32.partialorder %v337_v19, 0.5  ;;  %s277_s5 = scalar_lea.vmem [#allocation2], %s517_s29  ;;  %s774_s9 = scalar_lea.hbm %s825_s4, %s529_s30 }
  0x1d   : > { %v314_v4 = vsel %vm312_vm0, %v310_v1, 0.0  ;;  %v322_v5 = vcombine.high %v320_v3, %v320_v3  ;;  %v324_v6 = vsel %vm312_vm0, %v320_v3, 0.0  ;;  %v336_v23 = vld [vmem:[%s300_s24] sm:$0xf]  ;;  %s388_s6 = sshll.u32 %s277_s5, 4  ;;  %s674_s18 = smov [#allocation2]   ;;  %s776_s6 = int_to_ptr.vmem [resolvable:$true] %s388_s6 }
  0x1e   : > { %v315_v7 = vadd.f32 %v314_v4, %v313_v2  ;;  %s592_s11 = scalar_lea.vmem %s776_s6, 128  ;;  %s596_s12 = sshll.u32 %s674_s18, 4  ;;  %s597_s12 = int_to_ptr.vmem [resolvable:$false] %s596_s12 }
  0x1f   : > { %v325_v8 = vsel %vm312_vm0, %v322_v5, 0.0  ;;  %p593_p12 = scmp.ne.s32.totalorder %s776_s6, %s592_s11  ;;  %s598_s13 = scalar_lea.vmem %s597_s12, 256 }
  0x20   : > { %316 = vadd.xlane.f32.xlu0 %v315_v7  ;;  %v326_v9 = vadd.f32 %v325_v8, %v324_v6  ;;  %p599_p1 = scmp.lt.s32.totalorder %s776_s6, %s597_s12  ;;  %p600_p2 = scmp.lt.s32.totalorder %s598_s13, %s592_s11 }
  0x21   : > { %p594_p13 = pnand %p593_p12, %p740_p4 }
  0x22   : > { %p601_p3 = por %p600_p2, %p599_p1 }
  0x23   : > { %p595_p0 = pneg %p594_p13 }
  0x24   : > { %327 = vadd.xlane.f32.xlu0 %v326_v9 }
  0x25   : > { %p602_p5 = pnand %p601_p3, %p595_p0 }
  0xad   : > { %v317_v11 = vpop.xlane.xlu0 %316 }
  0xae   : > { %v319_v12 = vmul.f32 0.00390625, %v317_v11 }
  0xb0   : > { %v330_v14 = vmul.f32 %v319_v12, %v319_v12 }
  0xb1   : > { %v328_v13 = vpop.xlane.xlu0 %327 }
  0xb2   : > { %v329_v15 = vmul.f32 0.00390625, %v328_v13 }
  0xb4   : > { %v331_v16 = vsub.f32 %v329_v15, %v330_v14 }
  0xb6   : > { %v332_v17 = vmax.f32 %v331_v16, 0.0 }
  0xb8   : > { %v333_v18 = vadd.f32 1e-05, %v332_v17 }
  0xba   : > { %590 = vrsqrt.f32 %v333_v18 }
  0xc4   : > { %v591_v21 = vpop.eup %590 }
  0xc5   : > { %v339_v22 = vmul.f32 %v591_v21, %v335_v20 }
  0xc7   : > { %v340_v24 = vsel %vm338_vm1, %v339_v22, %v335_v20  ;;  %v341_v25 = vmul.f32 %v339_v22, %v319_v12 }
  0xc8   : > { %346 = vperm.xlu1 %587, %v340_v24  }
  0xc9   : > { %v342_v26 = vsub.f32 %v336_v23, %v341_v25 }
  0xcb   : > { %v343_v27 = vsel %vm338_vm1, %v342_v26, %v336_v23 }
  0xcc   : > { %359 = vperm.xlu1 %587, %v343_v27  }
 0x147   : > { %v347_v34 = vpop.permute.xlu1 %346 }
 0x148   : > { %v354_v35 = vrot.slane %v347_v34, %v353_v33 }
 0x14a   : > { %v356_v37 = vmul.f32 %v354_v35, %v308_v0 }
 0x14b   : > { %v360_v36 = vpop.permute.xlu1 %359 }
 0x14c   : > { %v367_v38 = vrot.slane %v360_v36, %v353_v33 }
 0x14e   : > { %v369_v39 = vadd.f32 %v367_v38, %v356_v37 }
 0x150   : > { %370 = vst [vmem:[%s277_s5] sm:$0xff] %v369_v39 }
 0x151   : > { %605 = shalt.err (!%p602_p5)
}
 0x152   : > { %s606_s14 = scalar_lea.hbm %s774_s9, 128  ;;  %s610_s24 = scalar_lea.hbm %s825_s4, 256 }
 0x153   : > { %p607_p6 = scmp.ne.s32.totalorder %s774_s9, %s606_s14  ;;  %p611_p10 = scmp.lt.u32.totalorder %s774_s9, %s825_s4 }
 0x154   : > { %p612_p11 = scmp.lt.u32.totalorder %s610_s24, %s606_s14  ;;  %p614_p13 = scmp.lt.u32.totalorder %s606_s14, %s774_s9 }
 0x155   : > { %p608_p7 = pnand %p607_p6, %p740_p4 }
 0x156   : > { %p613_p12 = por %p612_p11, %p611_p10 }
 0x157   : > { %p609_p9 = pneg %p608_p7 }
 0x158   : > { %p615_p0 = por %p614_p13, %p613_p12 }
 0x15a   : > { %p616_p1 = pnand %p615_p0, %p609_p9 }
 0x15c   : > { %619 = shalt.err (!%p616_p1)
}
 0x15d   : > { %530 = dma.vmem_to_hbm [thread:$0]  (%p740_p4), %s776_s6, 128, %s774_s9, %s372_s10  }
 0x15e PF: > { %p536_p2 = scmp.ge.s32.totalorder %s670_s20, 2  ;;  %s400_s30 = sand.u32 1, %s650_s15  }
 0x15f   : > { %s401_s5 = scalar_lea.sflag [#allocation3], %s400_s30 }
 0x160   : > { %p533_p3 = pnand %p536_p2, %p747_p8 }
 0x162   : > { %645 = dma.done.wait (!%p533_p3), %s401_s5, 128  }
 0x163   : > { %647 = vsyncadd (!%p533_p3), %s401_s5, 4294967168  ;;  %s17_s20 = sadd.s32 1, %s670_s20   ;;  %s828_s15 = smov %s654_s16 }
 0x164   : > { %p14_p5 = scmp.ge.s32.totalorder %s17_s20, 4   ;;  %s829_s16 = smov %s658_s17 }
 0x165   : > { %s830_s17 = smov %s753_s28  ;;  %s831_s18 = smov %s666_s19 }
 0x166   : > { %s832_s19 = smov %s834_s23  ;;  %16 = sbr.rel (!%p14_p5) target bundleno = 4 (0x4), region = 80 }
 0x16d   :  { %406 = vsyncpa [#allocation3], 1 }
 0x16e   :  { %408 = vsyncpa [#allocation3 + $0x1], 1 }

</bundles_post_ra>
